<compile_context>
chip_gen: v7x
topology: tpu7x:2x2x1
jax: 0.10.0
libtpu: 0.0.40
codegen_flags: <defaults>
</compile_context>

<pallas_src>
import functools

import jax
import jax.numpy as jnp
from jax.experimental import pallas as pl
from jax.experimental.pallas import tpu as pltpu


def _round_up(x: int, m: int) -> int:
    return (x + m - 1) // m * m


def mlp_kernel(x_ref, w1_ref, b1_ref, w2_ref, b2_ref, w3_ref, b3_ref, o_ref):
    # One batch tile per grid step. All three layers are fused; accumulation is
    # always f32 on the MXU, bias added in f32, ReLU on the VPU.
    x = x_ref[...]
    cdt = x.dtype

    h1 = jnp.dot(x, w1_ref[...], preferred_element_type=jnp.float32) + b1_ref[...]
    h1 = jnp.maximum(h1, 0.0).astype(cdt)

    h2 = jnp.dot(h1, w2_ref[...], preferred_element_type=jnp.float32) + b2_ref[...]
    h2 = jnp.maximum(h2, 0.0).astype(cdt)

    out = jnp.dot(h2, w3_ref[...], preferred_element_type=jnp.float32) + b3_ref[...]
    o_ref[...] = out.astype(o_ref.dtype)


@functools.partial(jax.jit, static_argnames=("compute_dtype", "max_tile_b"))
def mlp_forward(x, params, *, compute_dtype=jnp.float32, max_tile_b=512):
    """x: any shape (B, ...) — flattened to (B, F) like torch's x.view(B, -1)."""
    w1, b1, w2, b2, w3, b3 = params
    B = x.shape[0]
    x2d = x.reshape(B, -1)
    F = x2d.shape[1]
    H = w1.shape[1]
    C = w3.shape[1]

    # --- pad every dim to TPU tile granularity (zeros are exact through the net) ---
    F_pad = _round_up(F, 128)
    H_pad = _round_up(H, 128)
    C_pad = _round_up(C, 128)

    TILE_B = min(max_tile_b, _round_up(B, 8))   # sublane-aligned batch tile
    B_pad = _round_up(B, TILE_B)

    cdt = jnp.dtype(compute_dtype)
    xp = jnp.zeros((B_pad, F_pad), cdt).at[:B, :F].set(x2d.astype(cdt))
    w1p = jnp.zeros((F_pad, H_pad), cdt).at[:F, :H].set(w1.astype(cdt))
    w2p = jnp.zeros((H_pad, H_pad), cdt).at[:H, :H].set(w2.astype(cdt))
    w3p = jnp.zeros((H_pad, C_pad), cdt).at[:H, :C].set(w3.astype(cdt))
    # biases stay f32 (added to the f32 accumulator); 2D (1, N) for TPU layout
    b1p = jnp.zeros((1, H_pad), jnp.float32).at[:, :H].set(b1.reshape(1, -1).astype(jnp.float32))
    b2p = jnp.zeros((1, H_pad), jnp.float32).at[:, :H].set(b2.reshape(1, -1).astype(jnp.float32))
    b3p = jnp.zeros((1, C_pad), jnp.float32).at[:, :C].set(b3.reshape(1, -1).astype(jnp.float32))

    grid = (B_pad // TILE_B,)

    x_spec = pl.BlockSpec((TILE_B, F_pad), lambda i: (i, 0))
    o_spec = pl.BlockSpec((TILE_B, C_pad), lambda i: (i, 0))

    def resident(shape):
        # constant index_map -> DMA'd once, VMEM-resident across all batch tiles
        return pl.BlockSpec(shape, lambda i: (0, 0))

    in_specs = [
        x_spec,
        resident(w1p.shape), resident(b1p.shape),
        resident(w2p.shape), resident(b2p.shape),
        resident(w3p.shape), resident(b3p.shape),
    ]

    # --- VMEM budget (v7x-safe: 64 MiB physical, leave headroom) ---
    wbytes = (w1p.size + w2p.size + w3p.size) * cdt.itemsize \
             + (b1p.size + b2p.size + b3p.size) * 4
    tile_bytes = 2 * TILE_B * F_pad * cdt.itemsize + 2 * TILE_B * C_pad * 4  # dbl-buffered x, out
    vmem_limit = int(min(max(2 * (wbytes + tile_bytes), 16 * 1024 * 1024),
                         48 * 1024 * 1024))

    flops = 2 * B_pad * (F_pad * H_pad + H_pad * H_pad + H_pad * C_pad)
    bytes_accessed = int(xp.size * cdt.itemsize + wbytes + B_pad * C_pad * 4)

    out = pl.pallas_call(
        mlp_kernel,
        out_shape=jax.ShapeDtypeStruct((B_pad, C_pad), jnp.float32),
        grid=grid,
        in_specs=in_specs,
        out_specs=o_spec,
        compiler_params=pltpu.CompilerParams(
            dimension_semantics=("parallel",),   # shards batch tiles across TCs (v7x)
            vmem_limit_bytes=vmem_limit,
        ),
        cost_estimate=pl.CostEstimate(
            flops=flops, transcendentals=0, bytes_accessed=bytes_accessed),
    )(xp, w1p, b1p, w2p, b2p, w3p, b3p)

    return out[:B, :C]


def init_params(key, input_shape, n_filters, n_classes=10):
    """Deterministic init mirroring nn.Linear's U(-1/sqrt(fan_in), 1/sqrt(fan_in)).
    Weights are stored as (in, out) so the kernel does x @ W directly."""
    def linear_init(k, fan_in, fan_out):
        kw, kb = jax.random.split(k)
        bound = 1.0 / jnp.sqrt(fan_in)
        w = jax.random.uniform(kw, (fan_in, fan_out), jnp.float32, -bound, bound)
        b = jax.random.uniform(kb, (1, fan_out), jnp.float32, -bound, bound)
        return w, b

    k1, k2, k3 = jax.random.split(key, 3)
    w1, b1 = linear_init(k1, input_shape, n_filters)
    w2, b2 = linear_init(k2, n_filters, n_filters)
    w3, b3 = linear_init(k3, n_filters, n_classes)
    return (w1, b1, w2, b2, w3, b3)


if __name__ == "__main__":
    key = jax.random.PRNGKey(0)
    k_x, k_p = jax.random.split(key)

    # Small shapes: batch=2, a (4, 16, 16) "image" -> 1024 flattened features,
    # n_filters=32 hidden units, 10 output classes.
    batch, c, h, w = 2, 4, 16, 16
    input_shape = c * h * w   # 1024
    n_filters = 32

    x = jax.random.normal(k_x, (batch, c, h, w), jnp.float32)
    params = init_params(k_p, input_shape, n_filters)

    out = mlp_forward(x, params)                     # f32 compute, f32 accumulate
    out = jax.block_until_ready(out)

    # Sanity check against plain-JAX reference of the same math.
    w1, b1, w2, b2, w3, b3 = params
    x2d = x.reshape(batch, -1)
    ref = jnp.maximum(x2d @ w1 + b1, 0.0)
    ref = jnp.maximum(ref @ w2 + b2, 0.0)
    ref = ref @ w3 + b3
    assert out.shape == (batch, 10)
    assert jnp.allclose(out, ref, atol=1e-4, rtol=1e-4), (
        f"max abs err = {jnp.max(jnp.abs(out - ref))}")

    print("KERNEL_OK")
</pallas_src>

<mosaic_0001>
module attributes {stable_mosaic.version = 11 : i64} {
  func.func @mlp_kernel(%arg0: i32, %arg1: memref<8x1024xf32, #tpu.memory_space<vmem>>, %arg2: memref<1024x128xf32, #tpu.memory_space<vmem>>, %arg3: memref<1x128xf32, #tpu.memory_space<vmem>>, %arg4: memref<128x128xf32, #tpu.memory_space<vmem>>, %arg5: memref<1x128xf32, #tpu.memory_space<vmem>>, %arg6: memref<128x128xf32, #tpu.memory_space<vmem>>, %arg7: memref<1x128xf32, #tpu.memory_space<vmem>>, %arg8: memref<8x128xf32, #tpu.memory_space<vmem>>) attributes {dimension_semantics = [#tpu.dimension_semantics<parallel>], iteration_bounds = array<i64: 1>, scalar_prefetch = 0 : i64, scratch_operands = 0 : i64, tpu.core_type = #tpu.core_type<tc>, window_params = [{transform_indices = @transform_0, window_bounds = array<i64: 8, 1024>}, {pipeline_mode = #tpu.pipeline_mode<synchronous>, transform_indices = @transform_1, window_bounds = array<i64: 1024, 128>}, {pipeline_mode = #tpu.pipeline_mode<synchronous>, transform_indices = @transform_2, window_bounds = array<i64: 1, 128>}, {pipeline_mode = #tpu.pipeline_mode<synchronous>, transform_indices = @transform_3, window_bounds = array<i64: 128, 128>}, {pipeline_mode = #tpu.pipeline_mode<synchronous>, transform_indices = @transform_4, window_bounds = array<i64: 1, 128>}, {pipeline_mode = #tpu.pipeline_mode<synchronous>, transform_indices = @transform_5, window_bounds = array<i64: 128, 128>}, {pipeline_mode = #tpu.pipeline_mode<synchronous>, transform_indices = @transform_6, window_bounds = array<i64: 1, 128>}, {transform_indices = @transform_7, window_bounds = array<i64: 8, 128>}]} {
    %c0 = arith.constant 0 : index
    %c0_0 = arith.constant 0 : index
    %0 = vector.load %arg1[%c0, %c0_0] : memref<8x1024xf32, #tpu.memory_space<vmem>>, vector<8x1024xf32>
    %c0_1 = arith.constant 0 : index
    %c0_2 = arith.constant 0 : index
    %1 = vector.load %arg2[%c0_1, %c0_2] : memref<1024x128xf32, #tpu.memory_space<vmem>>, vector<1024x128xf32>
    %cst = arith.constant dense<0.000000e+00> : vector<8x128xf32>
    %2 = tpu.matmul %0, %1, %cst {dimension_numbers = #tpu.dot_dimension_numbers<[1], [0], [0], [1], [0, 0, 1, 1], [], []>} : vector<8x1024xf32>, vector<1024x128xf32>, vector<8x128xf32> -> vector<8x128xf32>
    %c0_3 = arith.constant 0 : index
    %c0_4 = arith.constant 0 : index
    %3 = vector.load %arg3[%c0_3, %c0_4] : memref<1x128xf32, #tpu.memory_space<vmem>>, vector<1x128xf32>
    %4 = vector.broadcast %3 : vector<1x128xf32> to vector<8x128xf32>
    %5 = arith.addf %2, %4 : vector<8x128xf32>
    %cst_5 = arith.constant 0.000000e+00 : f32
    %6 = vector.broadcast %cst_5 : f32 to vector<8x128xf32>
    %7 = arith.maximumf %5, %6 : vector<8x128xf32>
    %c0_6 = arith.constant 0 : index
    %c0_7 = arith.constant 0 : index
    %8 = vector.load %arg4[%c0_6, %c0_7] : memref<128x128xf32, #tpu.memory_space<vmem>>, vector<128x128xf32>
    %cst_8 = arith.constant dense<0.000000e+00> : vector<8x128xf32>
    %9 = tpu.matmul %7, %8, %cst_8 {dimension_numbers = #tpu.dot_dimension_numbers<[1], [0], [0], [1], [0, 0, 1, 1], [], []>} : vector<8x128xf32>, vector<128x128xf32>, vector<8x128xf32> -> vector<8x128xf32>
    %c0_9 = arith.constant 0 : index
    %c0_10 = arith.constant 0 : index
    %10 = vector.load %arg5[%c0_9, %c0_10] : memref<1x128xf32, #tpu.memory_space<vmem>>, vector<1x128xf32>
    %11 = vector.broadcast %10 : vector<1x128xf32> to vector<8x128xf32>
    %12 = arith.addf %9, %11 : vector<8x128xf32>
    %cst_11 = arith.constant 0.000000e+00 : f32
    %13 = vector.broadcast %cst_11 : f32 to vector<8x128xf32>
    %14 = arith.maximumf %12, %13 : vector<8x128xf32>
    %c0_12 = arith.constant 0 : index
    %c0_13 = arith.constant 0 : index
    %15 = vector.load %arg6[%c0_12, %c0_13] : memref<128x128xf32, #tpu.memory_space<vmem>>, vector<128x128xf32>
    %cst_14 = arith.constant dense<0.000000e+00> : vector<8x128xf32>
    %16 = tpu.matmul %14, %15, %cst_14 {dimension_numbers = #tpu.dot_dimension_numbers<[1], [0], [0], [1], [0, 0, 1, 1], [], []>} : vector<8x128xf32>, vector<128x128xf32>, vector<8x128xf32> -> vector<8x128xf32>
    %c0_15 = arith.constant 0 : index
    %c0_16 = arith.constant 0 : index
    %17 = vector.load %arg7[%c0_15, %c0_16] : memref<1x128xf32, #tpu.memory_space<vmem>>, vector<1x128xf32>
    %18 = vector.broadcast %17 : vector<1x128xf32> to vector<8x128xf32>
    %19 = arith.addf %16, %18 : vector<8x128xf32>
    %c0_17 = arith.constant 0 : index
    %c0_18 = arith.constant 0 : index
    %20 = vector.load %arg8[%c0_17, %c0_18] : memref<8x128xf32, #tpu.memory_space<vmem>>, vector<8x128xf32>
    tpu.vector_store %arg8[%c0_17, %c0_18], %19 {strides = array<i32>} : memref<8x128xf32, #tpu.memory_space<vmem>>, vector<8x128xf32>,
    return
  }
  func.func @transform_0(%arg0: i32) -> (i32, i32) {
    %c0_i32 = arith.constant 0 : i32
    %c0_i32_0 = arith.constant 0 : i32
    return %arg0, %c0_i32 : i32, i32
  }
  func.func @transform_1(%arg0: i32) -> (i32, i32) {
    %c0_i32 = arith.constant 0 : i32
    %c0_i32_0 = arith.constant 0 : i32
    %c0_i32_1 = arith.constant 0 : i32
    return %c0_i32, %c0_i32_0 : i32, i32
  }
  func.func @transform_2(%arg0: i32) -> (i32, i32) {
    %c0_i32 = arith.constant 0 : i32
    %c0_i32_0 = arith.constant 0 : i32
    %c0_i32_1 = arith.constant 0 : i32
    return %c0_i32, %c0_i32_0 : i32, i32
  }
  func.func @transform_3(%arg0: i32) -> (i32, i32) {
    %c0_i32 = arith.constant 0 : i32
    %c0_i32_0 = arith.constant 0 : i32
    %c0_i32_1 = arith.constant 0 : i32
    return %c0_i32, %c0_i32_0 : i32, i32
  }
  func.func @transform_4(%arg0: i32) -> (i32, i32) {
    %c0_i32 = arith.constant 0 : i32
    %c0_i32_0 = arith.constant 0 : i32
    %c0_i32_1 = arith.constant 0 : i32
    return %c0_i32, %c0_i32_0 : i32, i32
  }
  func.func @transform_5(%arg0: i32) -> (i32, i32) {
    %c0_i32 = arith.constant 0 : i32
    %c0_i32_0 = arith.constant 0 : i32
    %c0_i32_1 = arith.constant 0 : i32
    return %c0_i32, %c0_i32_0 : i32, i32
  }
  func.func @transform_6(%arg0: i32) -> (i32, i32) {
    %c0_i32 = arith.constant 0 : i32
    %c0_i32_0 = arith.constant 0 : i32
    %c0_i32_1 = arith.constant 0 : i32
    return %c0_i32, %c0_i32_0 : i32, i32
  }
  func.func @transform_7(%arg0: i32) -> (i32, i32) {
    %c0_i32 = arith.constant 0 : i32
    %c0_i32_0 = arith.constant 0 : i32
    return %arg0, %c0_i32 : i32, i32
  }
}

</mosaic_0001>

<bundles_post_ra>
// kernel: mlp_forward.1
= control target key start
LH: loop header
LB: loop body
LE: loop exit
PB: predicated region body
PF: predicated region fallthrough
CT: control target
= control target key end

     0   :  { %vm1069_vm0 = vmmov 0   ;;  %s1643_s1 = inlined_call_operand.vmem [shape: f32[1024,128], index: 1, kind: input, shape index: {}]   ;;  %s1644_s0 = inlined_call_operand.vmem [shape: f32[8,1024], index: 0, kind: input, shape index: {}]   ;;  %s1645_s3 = inlined_call_operand.vmem [shape: f32[128,128], index: 3, kind: input, shape index: {}]   ;;  %s1646_s5 = inlined_call_operand.vmem [shape: f32[128,128], index: 5, kind: input, shape index: {}]   ;;  %s1647_s2 = inlined_call_operand.vmem [shape: f32[1,128], index: 2, kind: input, shape index: {}]   ;;  %s1648_s4 = inlined_call_operand.vmem [shape: f32[1,128], index: 4, kind: input, shape index: {}]   ;;  %s1649_s6 = inlined_call_operand.vmem [shape: f32[1,128], index: 6, kind: input, shape index: {}]   ;;  %s1650_s7 = inlined_call_operand.vmem [shape: f32[8,128], index: 7, kind: output, shape index: {}]  }
   0x1   :  { %v50_v0 = vld [vmem:[%s1643_s1 + $0x80] sm:$0xff]  ;;  %v51_v1 = vld [vmem:[%s1643_s1 + $0x88] sm:$0xff]  ;;  %v52_v11 = vld [vmem:[%s1643_s1 + $0x90] sm:$0xff] }
   0x2   :  { %v34_v2 = vld [vmem:[%s1643_s1] sm:$0xff]  ;;  %v889_v3 = vpack.c.bf16 %v51_v1, %v50_v0  ;;  %v35_v4 = vld [vmem:[%s1643_s1 + $0x8] sm:$0xff]  ;;  %v53_v13 = vld [vmem:[%s1643_s1 + $0x98] sm:$0xff] }
   0x3   :  { %v82_v5 = vld [vmem:[%s1643_s1 + $0x180] sm:$0xff]  ;;  %v83_v6 = vld [vmem:[%s1643_s1 + $0x188] sm:$0xff]  ;;  %v891_v7 = vpack.c.bf16 %v35_v4, %v34_v2  ;;  %v36_v14 = vld [vmem:[%s1643_s1 + $0x10] sm:$0xff]  ;;  %v893_v16 = vpack.c.bf16 %v53_v13, %v52_v11 }
   0x4   :  { %v921_v8 = vpack.c.bf16 %v83_v6, %v82_v5  ;;  %v66_v9 = vld [vmem:[%s1643_s1 + $0x100] sm:$0xff]  ;;  %v67_v10 = vld [vmem:[%s1643_s1 + $0x108] sm:$0xff]  ;;  %890 = vmatprep.subr.bf16.mxu0 %v889_v3  ;;  %v37_v15 = vld [vmem:[%s1643_s1 + $0x18] sm:$0xff] }
   0x5   :  { %v923_v12 = vpack.c.bf16 %v67_v10, %v66_v9  ;;  %892 = vmatpush3.bf16.msra.mxu0 %v891_v7  ;;  %v895_v17 = vpack.c.bf16 %v37_v15, %v36_v14  ;;  %v84_v18 = vld [vmem:[%s1643_s1 + $0x190] sm:$0xff]  ;;  %v85_v19 = vld [vmem:[%s1643_s1 + $0x198] sm:$0xff]  ;;  %v54_v23 = vld [vmem:[%s1643_s1 + $0xa0] sm:$0xff] }
   0x6   :  { %922 = vmatprep.subr.bf16.mxu1 %v921_v8  ;;  %v68_v20 = vld [vmem:[%s1643_s1 + $0x110] sm:$0xff]  ;;  %v925_v21 = vpack.c.bf16 %v85_v19, %v84_v18  ;;  %v69_v22 = vld [vmem:[%s1643_s1 + $0x118] sm:$0xff]  ;;  %v55_v24 = vld [vmem:[%s1643_s1 + $0xa8] sm:$0xff]  ;;  %894 = vmatprep.subr.bf16.mxu0 %v893_v16 }
   0x7   :  { %924 = vmatpush3.bf16.msra.mxu1 %v923_v12  ;;  %v927_v25 = vpack.c.bf16 %v69_v22, %v68_v20  ;;  %v897_v26 = vpack.c.bf16 %v55_v24, %v54_v23  ;;  %v38_v27 = vld [vmem:[%s1643_s1 + $0x20] sm:$0xff]  ;;  %v39_v28 = vld [vmem:[%s1643_s1 + $0x28] sm:$0xff]  ;;  %v56_v35 = vld [vmem:[%s1643_s1 + $0xb0] sm:$0xff] }
   0x8   :  { %v86_v29 = vld [vmem:[%s1643_s1 + $0x1a0] sm:$0xff]  ;;  %926 = vmatprep.subr.bf16.mxu1 %v925_v21  ;;  %v87_v30 = vld [vmem:[%s1643_s1 + $0x1a8] sm:$0xff]  ;;  %v899_v33 = vpack.c.bf16 %v39_v28, %v38_v27  ;;  %v57_v36 = vld [vmem:[%s1643_s1 + $0xb8] sm:$0xff] }
   0x9   :  { %v70_v31 = vld [vmem:[%s1643_s1 + $0x120] sm:$0xff]  ;;  %v71_v32 = vld [vmem:[%s1643_s1 + $0x128] sm:$0xff]  ;;  %896 = vmatpush3.bf16.msra.mxu0 %v895_v17  ;;  %v929_v34 = vpack.c.bf16 %v87_v30, %v86_v29  ;;  %v40_v37 = vld [vmem:[%s1643_s1 + $0x30] sm:$0xff]  ;;  %v901_v39 = vpack.c.bf16 %v57_v36, %v56_v35 }
   0xa   :  { %898 = vmatprep.subr.bf16.mxu0 %v897_v26  ;;  %v931_v38 = vpack.c.bf16 %v71_v32, %v70_v31  ;;  %v41_v40 = vld [vmem:[%s1643_s1 + $0x38] sm:$0xff]  ;;  %v88_v41 = vld [vmem:[%s1643_s1 + $0x1b0] sm:$0xff]  ;;  %v58_v46 = vld [vmem:[%s1643_s1 + $0xc0] sm:$0xff] }
   0xb   :  { %928 = vmatpush3.bf16.msra.mxu1 %v927_v25  ;;  %v89_v42 = vld [vmem:[%s1643_s1 + $0x1b8] sm:$0xff]  ;;  %v72_v44 = vld [vmem:[%s1643_s1 + $0x130] sm:$0xff]  ;;  %v59_v47 = vld [vmem:[%s1643_s1 + $0xc8] sm:$0xff]  ;;  %v903_v48 = vpack.c.bf16 %v41_v40, %v40_v37 }
   0xc   :  { %930 = vmatprep.subr.bf16.mxu1 %v929_v34  ;;  %v933_v43 = vpack.c.bf16 %v89_v42, %v88_v41  ;;  %v73_v45 = vld [vmem:[%s1643_s1 + $0x138] sm:$0xff]  ;;  %v90_v49 = vld [vmem:[%s1643_s1 + $0x1c0] sm:$0xff]  ;;  %v91_v50 = vld [vmem:[%s1643_s1 + $0x1c8] sm:$0xff]  ;;  %v905_v52 = vpack.c.bf16 %v59_v47, %v58_v46 }
   0xd   :  { %900 = vmatpush3.bf16.msra.mxu0 %v899_v33  ;;  %v935_v51 = vpack.c.bf16 %v73_v45, %v72_v44  ;;  %v42_v53 = vld [vmem:[%s1643_s1 + $0x40] sm:$0xff]  ;;  %v43_v54 = vld [vmem:[%s1643_s1 + $0x48] sm:$0xff]  ;;  %v937_v56 = vpack.c.bf16 %v91_v50, %v90_v49  ;;  %v60_v58 = vld [vmem:[%s1643_s1 + $0xd0] sm:$0xff] }
   0xe   :  { %902 = vmatprep.subr.bf16.mxu0 %v901_v39  ;;  %v74_v55 = vld [vmem:[%s1643_s1 + $0x140] sm:$0xff]  ;;  %v75_v57 = vld [vmem:[%s1643_s1 + $0x148] sm:$0xff]  ;;  %v61_v59 = vld [vmem:[%s1643_s1 + $0xd8] sm:$0xff]  ;;  %v907_v62 = vpack.c.bf16 %v43_v54, %v42_v53 }
   0xf   :  { %932 = vmatpush3.bf16.msra.mxu1 %v931_v38  ;;  %v92_v60 = vld [vmem:[%s1643_s1 + $0x1d0] sm:$0xff]  ;;  %v93_v61 = vld [vmem:[%s1643_s1 + $0x1d8] sm:$0xff]  ;;  %v939_v63 = vpack.c.bf16 %v75_v57, %v74_v55  ;;  %v909_v0 = vpack.c.bf16 %v61_v59, %v60_v58  ;;  %v62_v6 = vld [vmem:[%s1643_s1 + $0xe0] sm:$0xff] }
  0x10   :  { %934 = vmatprep.subr.bf16.mxu1 %v933_v43  ;;  %v44_v1 = vld [vmem:[%s1643_s1 + $0x50] sm:$0xff]  ;;  %v45_v2 = vld [vmem:[%s1643_s1 + $0x58] sm:$0xff]  ;;  %v941_v4 = vpack.c.bf16 %v93_v61, %v92_v60  ;;  %v63_v7 = vld [vmem:[%s1643_s1 + $0xe8] sm:$0xff] }
  0x11   :  { %904 = vmatpush3.bf16.msra.mxu0 %v903_v48  ;;  %v76_v3 = vld [vmem:[%s1643_s1 + $0x150] sm:$0xff]  ;;  %v77_v5 = vld [vmem:[%s1643_s1 + $0x158] sm:$0xff]  ;;  %v94_v8 = vld [vmem:[%s1643_s1 + $0x1e0] sm:$0xff]  ;;  %v911_v10 = vpack.c.bf16 %v45_v2, %v44_v1  ;;  %v913_v14 = vpack.c.bf16 %v63_v7, %v62_v6 }
  0x12   :  { %906 = vmatprep.subr.bf16.mxu0 %v905_v52  ;;  %v95_v9 = vld [vmem:[%s1643_s1 + $0x1e8] sm:$0xff]  ;;  %v46_v11 = vld [vmem:[%s1643_s1 + $0x60] sm:$0xff]  ;;  %v943_v13 = vpack.c.bf16 %v77_v5, %v76_v3  ;;  %v64_v19 = vld [vmem:[%s1643_s1 + $0xf0] sm:$0xff] }
  0x13   :  { %936 = vmatpush3.bf16.msra.mxu1 %v935_v51  ;;  %v47_v12 = vld [vmem:[%s1643_s1 + $0x68] sm:$0xff]  ;;  %v78_v15 = vld [vmem:[%s1643_s1 + $0x160] sm:$0xff]  ;;  %v945_v18 = vpack.c.bf16 %v95_v9, %v94_v8  ;;  %v65_v20 = vld [vmem:[%s1643_s1 + $0xf8] sm:$0xff] }
  0x14   :  { %938 = vmatprep.subr.bf16.mxu1 %v937_v56  ;;  %v79_v16 = vld [vmem:[%s1643_s1 + $0x168] sm:$0xff]  ;;  %v29_v21 = vld [vmem:[%s1644_s0 + $0x18] sm:$0xff]  ;;  %v96_v22 = vld [vmem:[%s1643_s1 + $0x1f0] sm:$0xff]  ;;  %v915_v24 = vpack.c.bf16 %v47_v12, %v46_v11  ;;  %v917_v26 = vpack.c.bf16 %v65_v20, %v64_v19 }
  0x15   :  { %908 = vmatpush3.bf16.msra.mxu0 %v907_v62  ;;  %v27_v17 = vld [vmem:[%s1644_s0 + $0x8] sm:$0xff]  ;;  %v97_v23 = vld [vmem:[%s1643_s1 + $0x1f8] sm:$0xff]  ;;  %303 = vmatprep.mubr.f32.mxu1 %v29_v21  ;;  %v947_v25 = vpack.c.bf16 %v79_v16, %v78_v15  ;;  %v48_v27 = vld [vmem:[%s1643_s1 + $0x70] sm:$0xff] }
  0x16   :  { %910 = vmatprep.subr.bf16.mxu0 %v909_v0  ;;  %233 = vmatprep.mubr.f32.mxu0 %v27_v17  ;;  %v49_v28 = vld [vmem:[%s1643_s1 + $0x78] sm:$0xff]  ;;  %v80_v29 = vld [vmem:[%s1643_s1 + $0x170] sm:$0xff]  ;;  %v949_v30 = vpack.c.bf16 %v97_v23, %v96_v22  ;;  %v114_v32 = vld [vmem:[%s1643_s1 + $0x280] sm:$0xff] }
  0x17   :  { %940 = vmatpush3.bf16.msra.mxu1 %v939_v63  ;;  %v81_v31 = vld [vmem:[%s1643_s1 + $0x178] sm:$0xff]  ;;  %v115_v33 = vld [vmem:[%s1643_s1 + $0x288] sm:$0xff]  ;;  %v146_v34 = vld [vmem:[%s1643_s1 + $0x380] sm:$0xff]  ;;  %v919_v36 = vpack.c.bf16 %v49_v28, %v48_v27 }
  0x18   :  { %942 = vmatprep.subr.bf16.mxu1 %v941_v4  ;;  %v147_v35 = vld [vmem:[%s1643_s1 + $0x388] sm:$0xff]  ;;  %v951_v37 = vpack.c.bf16 %v81_v31, %v80_v29  ;;  %v953_v38 = vpack.c.bf16 %v115_v33, %v114_v32  ;;  %v98_v39 = vld [vmem:[%s1643_s1 + $0x200] sm:$0xff]  ;;  %v116_v44 = vld [vmem:[%s1643_s1 + $0x290] sm:$0xff] }
  0x19   :  { %912 = vmatpush3.bf16.msra.mxu0 %v911_v10  ;;  %v99_v40 = vld [vmem:[%s1643_s1 + $0x208] sm:$0xff]  ;;  %v130_v41 = vld [vmem:[%s1643_s1 + $0x300] sm:$0xff]  ;;  %v985_v42 = vpack.c.bf16 %v147_v35, %v146_v34  ;;  %v117_v45 = vld [vmem:[%s1643_s1 + $0x298] sm:$0xff] }
  0x1a   :  { %914 = vmatprep.subr.bf16.mxu0 %v913_v14  ;;  %v131_v43 = vld [vmem:[%s1643_s1 + $0x308] sm:$0xff]  ;;  %v148_v46 = vld [vmem:[%s1643_s1 + $0x390] sm:$0xff]  ;;  %v149_v47 = vld [vmem:[%s1643_s1 + $0x398] sm:$0xff]  ;;  %v955_v49 = vpack.c.bf16 %v99_v40, %v98_v39  ;;  %v957_v52 = vpack.c.bf16 %v117_v45, %v116_v44 }
  0x1b   :  { %944 = vmatpush3.bf16.msra.mxu1 %v943_v13  ;;  %v26_v48 = vld [vmem:[%s1644_s0] sm:$0xff]  ;;  %v28_v50 = vld [vmem:[%s1644_s0 + $0x10] sm:$0xff]  ;;  %v987_v51 = vpack.c.bf16 %v131_v43, %v130_v41  ;;  %v101_v54 = vld [vmem:[%s1643_s1 + $0x218] sm:$0xff]  ;;  %v989_v56 = vpack.c.bf16 %v149_v47, %v148_v46 }
  0x1c   :  { %946 = vmatprep.subr.bf16.mxu1 %v945_v18  ;;  %v100_v53 = vld [vmem:[%s1643_s1 + $0x210] sm:$0xff]  ;;  %v133_v57 = vld [vmem:[%s1643_s1 + $0x318] sm:$0xff]  ;;  %v118_v58 = vld [vmem:[%s1643_s1 + $0x2a0] sm:$0xff] }
  0x1d   :  { %916 = vmatpush3.bf16.msra.mxu0 %v915_v24  ;;  %v132_v55 = vld [vmem:[%s1643_s1 + $0x310] sm:$0xff]  ;;  %v119_v59 = vld [vmem:[%s1643_s1 + $0x2a8] sm:$0xff]  ;;  %v150_v60 = vld [vmem:[%s1643_s1 + $0x3a0] sm:$0xff]  ;;  %v959_v62 = vpack.c.bf16 %v101_v54, %v100_v53 }
  0x1e   :  { %918 = vmatprep.subr.bf16.mxu0 %v917_v26  ;;  %v151_v61 = vld [vmem:[%s1643_s1 + $0x3a8] sm:$0xff]  ;;  %v991_v63 = vpack.c.bf16 %v133_v57, %v132_v55  ;;  %v961_v0 = vpack.c.bf16 %v119_v59, %v118_v58  ;;  %v102_v1 = vld [vmem:[%s1643_s1 + $0x220] sm:$0xff]  ;;  %v120_v6 = vld [vmem:[%s1643_s1 + $0x2b0] sm:$0xff] }
  0x1f   :  { %948 = vmatpush3.bf16.msra.mxu1 %v947_v25  ;;  %v103_v2 = vld [vmem:[%s1643_s1 + $0x228] sm:$0xff]  ;;  %v134_v3 = vld [vmem:[%s1643_s1 + $0x320] sm:$0xff]  ;;  %v993_v4 = vpack.c.bf16 %v151_v61, %v150_v60  ;;  %v121_v7 = vld [vmem:[%s1643_s1 + $0x2b8] sm:$0xff] }
  0x20   :  { %950 = vmatprep.subr.bf16.mxu1 %v949_v30  ;;  %v135_v5 = vld [vmem:[%s1643_s1 + $0x328] sm:$0xff]  ;;  %v152_v8 = vld [vmem:[%s1643_s1 + $0x3b0] sm:$0xff]  ;;  %v153_v9 = vld [vmem:[%s1643_s1 + $0x3b8] sm:$0xff]  ;;  %v963_v10 = vpack.c.bf16 %v103_v2, %v102_v1  ;;  %v965_v12 = vpack.c.bf16 %v121_v7, %v120_v6 }
  0x21   :  { %920 = vmatpush3.bf16.msra.mxu0 %v919_v36  ;;  %v995_v11 = vpack.c.bf16 %v135_v5, %v134_v3  ;;  %v104_v13 = vld [vmem:[%s1643_s1 + $0x230] sm:$0xff]  ;;  %v105_v14 = vld [vmem:[%s1643_s1 + $0x238] sm:$0xff]  ;;  %v997_v16 = vpack.c.bf16 %v153_v9, %v152_v8  ;;  %v122_v18 = vld [vmem:[%s1643_s1 + $0x2c0] sm:$0xff]  ;;  %v1068_v8 = vmov 0.0|0.0  }
  0x22   :  { %954 = vmatprep.subr.bf16.mxu0 %v953_v38  ;;  %v136_v15 = vld [vmem:[%s1643_s1 + $0x330] sm:$0xff]  ;;  %v137_v17 = vld [vmem:[%s1643_s1 + $0x338] sm:$0xff]  ;;  %v123_v19 = vld [vmem:[%s1643_s1 + $0x2c8] sm:$0xff]  ;;  %v967_v22 = vpack.c.bf16 %v105_v14, %v104_v13 }
  0x23   :  { %952 = vmatpush3.bf16.msra.mxu1 %v951_v37  ;;  %v154_v20 = vld [vmem:[%s1643_s1 + $0x3c0] sm:$0xff]  ;;  %v155_v21 = vld [vmem:[%s1643_s1 + $0x3c8] sm:$0xff]  ;;  %v33_v24 = vld [vmem:[%s1644_s0 + $0x38] sm:$0xff]  ;;  %v999_v25 = vpack.c.bf16 %v137_v17, %v136_v15  ;;  %v969_v26 = vpack.c.bf16 %v123_v19, %v122_v18 }
  0x24   :  { %986 = vmatprep.subr.bf16.mxu1 %v985_v42  ;;  %234 = vmatmul.mubr.f32.vlgmr.msra.gmra.mrb[0].mxu0 %v26_v48  ;;  %v31_v23 = vld [vmem:[%s1644_s0 + $0x28] sm:$0xff]  ;;  %v106_v27 = vld [vmem:[%s1643_s1 + $0x240] sm:$0xff]  ;;  %v1001_v30 = vpack.c.bf16 %v155_v21, %v154_v20  ;;  %v124_v32 = vld [vmem:[%s1643_s1 + $0x2d0] sm:$0xff] }
  0x25   :  { %956 = vmatpush3.bf16.msra.mxu0 %v955_v49  ;;  %v107_v28 = vld [vmem:[%s1643_s1 + $0x248] sm:$0xff]  ;;  %v138_v29 = vld [vmem:[%s1643_s1 + $0x340] sm:$0xff]  ;;  %v125_v33 = vld [vmem:[%s1643_s1 + $0x2d8] sm:$0xff]  ;;  %373 = vmatprep.mubr.f32.mxu0 %v31_v23 }
  0x26   :  { %304 = vmatmul.mubr.f32.vlgmr.msra.gmra.mrb[0].mxu1 %v28_v50  ;;  %958 = vmatprep.subr.bf16.mxu0 %v957_v52  ;;  %v139_v31 = vld [vmem:[%s1643_s1 + $0x348] sm:$0xff]  ;;  %v156_v34 = vld [vmem:[%s1643_s1 + $0x3d0] sm:$0xff]  ;;  %v157_v35 = vld [vmem:[%s1643_s1 + $0x3d8] sm:$0xff]  ;;  %v971_v36 = vpack.c.bf16 %v107_v28, %v106_v27  ;;  %v973_v38 = vpack.c.bf16 %v125_v33, %v124_v32  ;;  %v1070_v33 = vmov 0.0  }
  0x27   :  { %988 = vmatpush3.bf16.msra.mxu1 %v987_v51  ;;  %443 = vmatprep.mubr.f32.mxu1 %v33_v24  ;;  %v1003_v37 = vpack.c.bf16 %v139_v31, %v138_v29  ;;  %v108_v39 = vld [vmem:[%s1643_s1 + $0x250] sm:$0xff]  ;;  %v109_v40 = vld [vmem:[%s1643_s1 + $0x258] sm:$0xff]  ;;  %v1005_v42 = vpack.c.bf16 %v157_v35, %v156_v34  ;;  %v126_v44 = vld [vmem:[%s1643_s1 + $0x2e0] sm:$0xff] }
  0x28   :  { %990 = vmatprep.subr.bf16.mxu1 %v989_v56  ;;  %v140_v41 = vld [vmem:[%s1643_s1 + $0x350] sm:$0xff]  ;;  %v141_v43 = vld [vmem:[%s1643_s1 + $0x358] sm:$0xff]  ;;  %v127_v45 = vld [vmem:[%s1643_s1 + $0x2e8] sm:$0xff]  ;;  %v975_v48 = vpack.c.bf16 %v109_v40, %v108_v39 }
  0x29   :  { %960 = vmatpush3.bf16.msra.mxu0 %v959_v62  ;;  %v158_v46 = vld [vmem:[%s1643_s1 + $0x3e0] sm:$0xff]  ;;  %v159_v47 = vld [vmem:[%s1643_s1 + $0x3e8] sm:$0xff]  ;;  %v1007_v49 = vpack.c.bf16 %v141_v43, %v140_v41  ;;  %v977_v50 = vpack.c.bf16 %v127_v45, %v126_v44  ;;  %v128_v56 = vld [vmem:[%s1643_s1 + $0x2f0] sm:$0xff] }
  0x2a   :  { %962 = vmatprep.subr.bf16.mxu0 %v961_v0  ;;  %v110_v51 = vld [vmem:[%s1643_s1 + $0x260] sm:$0xff]  ;;  %v111_v52 = vld [vmem:[%s1643_s1 + $0x268] sm:$0xff]  ;;  %v1009_v54 = vpack.c.bf16 %v159_v47, %v158_v46  ;;  %v129_v57 = vld [vmem:[%s1643_s1 + $0x2f8] sm:$0xff] }
  0x2b   :  { %992 = vmatpush3.bf16.msra.mxu1 %v991_v63  ;;  %v142_v53 = vld [vmem:[%s1643_s1 + $0x360] sm:$0xff]  ;;  %v143_v55 = vld [vmem:[%s1643_s1 + $0x368] sm:$0xff]  ;;  %v160_v58 = vld [vmem:[%s1643_s1 + $0x3f0] sm:$0xff]  ;;  %v979_v60 = vpack.c.bf16 %v111_v52, %v110_v51  ;;  %v981_v62 = vpack.c.bf16 %v129_v57, %v128_v56 }
  0x2c   :  { %994 = vmatprep.subr.bf16.mxu1 %v993_v4  ;;  %v161_v59 = vld [vmem:[%s1643_s1 + $0x3f8] sm:$0xff]  ;;  %v1011_v61 = vpack.c.bf16 %v143_v55, %v142_v53  ;;  %v112_v63 = vld [vmem:[%s1643_s1 + $0x270] sm:$0xff]  ;;  %v30_v6 = vld [vmem:[%s1644_s0 + $0x20] sm:$0xff] }
  0x2d   :  { %964 = vmatpush3.bf16.msra.mxu0 %v963_v10  ;;  %v113_v0 = vld [vmem:[%s1643_s1 + $0x278] sm:$0xff]  ;;  %v1013_v1 = vpack.c.bf16 %v161_v59, %v160_v58  ;;  %v144_v2 = vld [vmem:[%s1643_s1 + $0x370] sm:$0xff]  ;;  %v450_v9 = vld [vmem:[%s1645_s3] sm:$0xff] }
  0x2e   :  { %966 = vmatprep.subr.bf16.mxu0 %v965_v12  ;;  %v145_v3 = vld [vmem:[%s1643_s1 + $0x378] sm:$0xff]  ;;  %v983_v4 = vpack.c.bf16 %v113_v0, %v112_v63  ;;  %v32_v7 = vld [vmem:[%s1644_s0 + $0x30] sm:$0xff]  ;;  %v451_v10 = vld [vmem:[%s1645_s3 + $0x8] sm:$0xff] }
  0x2f   :  { %996 = vmatpush3.bf16.msra.mxu1 %v995_v11  ;;  %v1015_v5 = vpack.c.bf16 %v145_v3, %v144_v2  ;;  %v452_v11 = vld [vmem:[%s1645_s3 + $0x10] sm:$0xff]  ;;  %v1018_v12 = vpack.c.bf16 %v451_v10, %v450_v9  ;;  %v453_v13 = vld [vmem:[%s1645_s3 + $0x18] sm:$0xff]  ;;  %v454_v15 = vld [vmem:[%s1645_s3 + $0x20] sm:$0xff] }
  0x30   :  { %998 = vmatprep.subr.bf16.mxu1 %v997_v16  ;;  %v1021_v14 = vpack.c.bf16 %v453_v13, %v452_v11  ;;  %v455_v16 = vld [vmem:[%s1645_s3 + $0x28] sm:$0xff]  ;;  %v456_v18 = vld [vmem:[%s1645_s3 + $0x30] sm:$0xff]  ;;  %v457_v19 = vld [vmem:[%s1645_s3 + $0x38] sm:$0xff] }
  0x31   :  { %968 = vmatpush3.bf16.msra.mxu0 %v967_v22  ;;  %v1024_v17 = vpack.c.bf16 %v455_v16, %v454_v15  ;;  %v1027_v20 = vpack.c.bf16 %v457_v19, %v456_v18  ;;  %v458_v21 = vld [vmem:[%s1645_s3 + $0x40] sm:$0xff]  ;;  %v459_v22 = vld [vmem:[%s1645_s3 + $0x48] sm:$0xff]  ;;  %v460_v24 = vld [vmem:[%s1645_s3 + $0x50] sm:$0xff] }
  0x32   :  { %970 = vmatprep.subr.bf16.mxu0 %v969_v26  ;;  %v1030_v23 = vpack.c.bf16 %v459_v22, %v458_v21  ;;  %v462_v27 = vld [vmem:[%s1645_s3 + $0x60] sm:$0xff]  ;;  %v463_v28 = vld [vmem:[%s1645_s3 + $0x68] sm:$0xff]  ;;  %v465_v31 = vld [vmem:[%s1645_s3 + $0x78] sm:$0xff] }
  0x33   :  { %1000 = vmatpush3.bf16.msra.mxu1 %v999_v25  ;;  %v461_v25 = vld [vmem:[%s1645_s3 + $0x58] sm:$0xff]  ;;  %v1036_v29 = vpack.c.bf16 %v463_v28, %v462_v27  ;;  %v544_v34 = vld [vmem:[%s1646_s5] sm:$0xff]  ;;  %v545_v35 = vld [vmem:[%s1646_s5 + $0x8] sm:$0xff] }
  0x34   :  { %1002 = vmatprep.subr.bf16.mxu1 %v1001_v30  ;;  %v1033_v26 = vpack.c.bf16 %v461_v25, %v460_v24  ;;  %v464_v30 = vld [vmem:[%s1645_s3 + $0x70] sm:$0xff]  ;;  %v548_v40 = vld [vmem:[%s1646_s5 + $0x20] sm:$0xff]  ;;  %v549_v41 = vld [vmem:[%s1646_s5 + $0x28] sm:$0xff] }
  0x35   :  { %972 = vmatpush3.bf16.msra.mxu0 %v971_v36  ;;  %v1039_v32 = vpack.c.bf16 %v465_v31, %v464_v30  ;;  %v546_v36 = vld [vmem:[%s1646_s5 + $0x10] sm:$0xff]  ;;  %v551_v44 = vld [vmem:[%s1646_s5 + $0x38] sm:$0xff]  ;;  %v552_v46 = vld [vmem:[%s1646_s5 + $0x40] sm:$0xff] }
  0x36   :  { %974 = vmatprep.subr.bf16.mxu0 %v973_v38  ;;  %v547_v38 = vld [vmem:[%s1646_s5 + $0x18] sm:$0xff]  ;;  %v550_v43 = vld [vmem:[%s1646_s5 + $0x30] sm:$0xff]  ;;  %v553_v47 = vld [vmem:[%s1646_s5 + $0x48] sm:$0xff] }
  0x37   :  { %1004 = vmatpush3.bf16.msra.mxu1 %v1003_v37  ;;  %v1042_v37 = vpack.c.bf16 %v545_v35, %v544_v34  ;;  %v1045_v39 = vpack.c.bf16 %v547_v38, %v546_v36  ;;  %v1051_v45 = vpack.c.bf16 %v551_v44, %v550_v43  ;;  %v556_v52 = vld [vmem:[%s1646_s5 + $0x60] sm:$0xff]  ;;  %v557_v53 = vld [vmem:[%s1646_s5 + $0x68] sm:$0xff]  ;;  %v558_v9 = vld [vmem:[%s1646_s5 + $0x70] sm:$0xff] }
  0x38   :  { %1006 = vmatprep.subr.bf16.mxu1 %v1005_v42  ;;  %v1048_v42 = vpack.c.bf16 %v549_v41, %v548_v40  ;;  %v642_v56 = vld [vmem:[%s1647_s2] ss:$0 sm:$0xff]  ;;  %v559_v10 = vld [vmem:[%s1646_s5 + $0x78] sm:$0xff] }
  0x39   :  { %976 = vmatpush3.bf16.msra.mxu0 %v975_v48  ;;  %v1054_v48 = vpack.c.bf16 %v553_v47, %v552_v46  ;;  %v1063_v11 = vpack.c.bf16 %v559_v10, %v558_v9 }
  0x3a   :  { %978 = vmatprep.subr.bf16.mxu0 %v977_v50  ;;  %v555_v50 = vld [vmem:[%s1646_s5 + $0x58] sm:$0xff] }
  0x3b   :  { %1008 = vmatpush3.bf16.msra.mxu1 %v1007_v49  ;;  %v554_v49 = vld [vmem:[%s1646_s5 + $0x50] sm:$0xff] }
  0x3c   :  { %1010 = vmatprep.subr.bf16.mxu1 %v1009_v54  ;;  %v1057_v51 = vpack.c.bf16 %v555_v50, %v554_v49  ;;  %v1060_v54 = vpack.c.bf16 %v557_v53, %v556_v52 }
  0x3d   :  { %980 = vmatpush3.bf16.msra.mxu0 %v979_v60 }
  0x3e   :  { %982 = vmatprep.subr.bf16.mxu0 %v981_v62 }
  0x3f   :  { %1012 = vmatpush3.bf16.msra.mxu1 %v1011_v61 }
  0x40   :  { %1014 = vmatprep.subr.bf16.mxu1 %v1013_v1 }
  0x41   :  { %984 = vmatpush3.bf16.msra.mxu0 %v983_v4 }
  0x42   :  { %1017 = vmatprep.subr.bf16.mxu0 %v1068_v8 }
  0x43   :  { %1016 = vmatpush3.bf16.msra.mxu1 %v1015_v5 }
  0x44   :  { %374 = vmatmul.mubr.f32.vlgmr.msra.gmra.mrb[2].mxu0 %v30_v6  ;;  %1041 = vmatprep.subr.bf16.mxu1 %v1068_v8 }
  0x45   :  { %1019 = vmatpush3.bf16.msra.mxu0 %v1018_v12  ;;  %851 = vmatprep.mubr.msk.f32.mxu0 %vm1069_vm0, %v1070_v33  ;;  %v643_v12 = vld [vmem:[%s1648_s4] ss:$0 sm:$0xff] }
  0x46   :  { %444 = vmatmul.mubr.f32.vlgmr.msra.gmra.mrb[2].mxu1 %v32_v7  ;;  %1020 = vmatprep.subr.bf16.mxu0 %v1068_v8 }
  0x47   :  { %886 = vmatprep.mubr.msk.f32.mxu1 %vm1069_vm0, %v1070_v33  ;;  %1043 = vmatpush3.bf16.msra.mxu1 %v1042_v37 }
  0x48   :  { %1044 = vmatprep.subr.bf16.mxu1 %v1068_v8 }
  0x49   :  { %1022 = vmatpush3.bf16.msra.mxu0 %v1021_v14 }
  0x4a   :  { %1023 = vmatprep.subr.bf16.mxu0 %v1068_v8 }
  0x4b   :  { %1046 = vmatpush3.bf16.msra.mxu1 %v1045_v39 }
  0x4c   :  { %1047 = vmatprep.subr.bf16.mxu1 %v1068_v8 }
  0x4d   :  { %1025 = vmatpush3.bf16.msra.mxu0 %v1024_v17  ;;  %v644_v17 = vld [vmem:[%s1649_s6] ss:$0 sm:$0xff] }
  0x4e   :  { %1026 = vmatprep.subr.bf16.mxu0 %v1068_v8 }
  0x4f   :  { %1049 = vmatpush3.bf16.msra.mxu1 %v1048_v42 }
  0x50   :  { %1050 = vmatprep.subr.bf16.mxu1 %v1068_v8 }
  0x51   :  { %1028 = vmatpush3.bf16.msra.mxu0 %v1027_v20 }
  0x52   :  { %1029 = vmatprep.subr.bf16.mxu0 %v1068_v8 }
  0x53   :  { %1052 = vmatpush3.bf16.msra.mxu1 %v1051_v45 }
  0x54   :  { %1053 = vmatprep.subr.bf16.mxu1 %v1068_v8 }
  0x55   :  { %1031 = vmatpush3.bf16.msra.mxu0 %v1030_v23 }
  0x56   :  { %1032 = vmatprep.subr.bf16.mxu0 %v1068_v8 }
  0x57   :  { %1055 = vmatpush3.bf16.msra.mxu1 %v1054_v48 }
  0x58   :  { %1056 = vmatprep.subr.bf16.mxu1 %v1068_v8 }
  0x59   :  { %1034 = vmatpush3.bf16.msra.mxu0 %v1033_v26 }
  0x5a   :  { %1035 = vmatprep.subr.bf16.mxu0 %v1068_v8 }
  0x5b   :  { %1058 = vmatpush3.bf16.msra.mxu1 %v1057_v51 }
  0x5c   :  { %1059 = vmatprep.subr.bf16.mxu1 %v1068_v8 }
  0x5d   :  { %1037 = vmatpush3.bf16.msra.mxu0 %v1036_v29 }
  0x5e   :  { %1038 = vmatprep.subr.bf16.mxu0 %v1068_v8 }
  0x5f   :  { %1061 = vmatpush3.bf16.msra.mxu1 %v1060_v54 }
  0x60   :  { %1062 = vmatprep.subr.bf16.mxu1 %v1068_v8 }
  0x61   :  { %1040 = vmatpush3.bf16.msra.mxu0 %v1039_v32 }
  0x63   :  { %1064 = vmatpush3.bf16.msra.mxu1 %v1063_v11 }
  0xf7   :  { %v677_v55 = vpop.f32.mrb[0].mxu0 }
  0xf8   :  { %v678_v57 = vpop.f32.mrb[1].mxu0 }
  0xf9   :  { %v712_v58 = vpop.f32.mrb[0].mxu1  ;;  %v679_v59 = vadd.f32 %v678_v57, %v677_v55 }
  0xfa   :  { %v713_v60 = vpop.f32.mrb[1].mxu1 }
  0xfb   :  { %v714_v61 = vadd.f32 %v713_v60, %v712_v58  ;;  %v236_v62 = vadd.f32 %v679_v59, %v642_v56 }
  0xfd   :  { %v306_v63 = vadd.f32 %v714_v61, %v236_v62 }
 0x117   :  { %v747_v0 = vpop.f32.mrb[2].mxu0 }
 0x118   :  { %v748_v1 = vpop.f32.mrb[3].mxu0 }
 0x119   :  { %v782_v2 = vpop.f32.mrb[2].mxu1  ;;  %v749_v3 = vadd.f32 %v748_v1, %v747_v0 }
 0x11a   :  { %v783_v4 = vpop.f32.mrb[3].mxu1 }
 0x11b   :  { %v784_v5 = vadd.f32 %v783_v4, %v782_v2  ;;  %v376_v6 = vadd.f32 %v749_v3, %v306_v63 }
 0x11d   :  { %v446_v7 = vadd.f32 %v784_v5, %v376_v6 }
 0x11f   :  { %v449_v8 = vmax.f32 %v446_v7, 0.0 }
 0x121   :  { %852 = vmatmul.mubr.f32.vlgmr.msra.gmra.mrb[4].mxu0 %v449_v8 }
 0x1f4   :  { %v539_v13 = vpop.f32.mrb[4].mxu0 }
 0x1f5   :  { %v540_v14 = vadd.f32 %v643_v12, %v539_v13  ;;  %v853_v15 = vpop.f32.mrb[5].mxu0 }
 0x1f7   :  { %v543_v16 = vmax.f32 %v540_v14, 0.0 }
 0x1f9   :  { %887 = vmatmul.mubr.f32.vlgmr.msra.gmra.mrb[4].mxu1 %v543_v16 }
 0x2cc   :  { %v633_v18 = vpop.f32.mrb[4].mxu1 }
 0x2cd   :  { %v634_v19 = vadd.f32 %v644_v17, %v633_v18  ;;  %v888_v20 = vpop.f32.mrb[5].mxu1 }
 0x2cf   :  { %637 = vst [vmem:[%s1650_s7] sm:$0xff] %v634_v19 }

</bundles_post_ra>
